<compile_context>
chip_gen: v7x
topology: tpu7x:2x2x1
jax: 0.10.0
libtpu: 0.0.40
codegen_flags: <defaults>
</compile_context>

<pallas_src>
import jax
import jax.numpy as jnp
from jax.experimental import pallas as pl
from jax.experimental.pallas import tpu as pltpu

BN_EPS = 1e-5
LEAKY_SLOPE = 0.1


def _round_up(x, m):
    return (x + m - 1) // m * m


def _apply_activation(z, activation):
    if activation == "leaky":
        return jnp.where(z > 0, z, LEAKY_SLOPE * z)
    if activation == "relu":
        return jnp.maximum(z, 0.0)
    if activation == "mish":
        sp = jnp.maximum(z, 0.0) + jnp.log1p(jnp.exp(-jnp.abs(z)))  # softplus
        return z * jnp.tanh(sp)
    return z  # 'linear'


def conv_bn_activation(x_nchw, weight, gamma, beta, *, stride=1,
                       activation="leaky"):
    """x_nchw: (N, Cin, H, W) f32; weight: (Cout, Cin, Kh, Kw) (PyTorch OIHW)."""
    N, Cin, H, W = x_nchw.shape
    Cout, _, Kh, Kw = weight.shape
    pad = (Kh - 1) // 2
    Ho = (H + 2 * pad - Kh) // stride + 1
    Wo = (W + 2 * pad - Kw) // stride + 1
    Hp, Wp = H + 2 * pad, W + 2 * pad

    Cin_p = _round_up(Cin, 16)      # bf16 sublane-friendly contraction depth / tap
    Cout_p = _round_up(Cout, 128)   # lane-dense output channels
    TR = 8 if Ho % 8 == 0 else Ho   # output rows per tile -> TR*Wo GEMM rows
    R = Ho // TR
    halo_rows = (TR - 1) * stride + Kh

    # ---- glue (single HBM pass): NCHW -> padded NHWC bf16, weight repack ----
    # TODO(synk): keep NHWC end-to-end in the surrounding model to drop the two
    # layout transposes (each is an extra HBM read+write outside the kernels).
    x = jnp.transpose(x_nchw, (0, 2, 3, 1)).astype(jnp.float32)
    x = jnp.pad(x, ((0, 0), (pad, pad), (pad, pad), (0, Cin_p - Cin)))
    x = x.astype(jnp.bfloat16)                                    # (N, Hp, Wp, Cin_p)

    w = jnp.transpose(weight, (2, 3, 1, 0)).reshape(Kh * Kw, Cin, Cout)
    w = jnp.pad(w, ((0, 0), (0, Cin_p - Cin), (0, Cout_p - Cout)))
    w = w.astype(jnp.bfloat16)                                    # (Kh*Kw, Cin_p, Cout_p)

    # ---------------- pass 1: conv GEMM + per-tile BN partial stats ----------------
    def conv_stats_kernel(x_ref, w_ref, y_ref, psum_ref, psq_ref):
        r = pl.program_id(1)
        row0 = pl.multiple_of(r * (TR * stride), TR * stride)
        # halo'd input rows for this output-row tile (VMEM -> vregs, no HBM traffic)
        halo = x_ref[0, pl.ds(row0, halo_rows), :, :]   # (halo_rows, Wp, Cin_p) bf16
        acc = jnp.zeros((TR * Wo, Cout_p), jnp.float32)
        for kh in range(Kh):                  # unrolled: Kh*Kw shifted MXU matmuls
            for kw in range(Kw):
                patch = halo[kh:kh + (TR - 1) * stride + 1:stride,
                             kw:kw + (Wo - 1) * stride + 1:stride, :]
                acc = acc + jnp.dot(patch.reshape(TR * Wo, Cin_p),
                                    w_ref[kh * Kw + kw],
                                    preferred_element_type=jnp.float32)
        y_ref[0] = acc.reshape(TR, Wo, Cout_p)
        # per-tile partial BN statistics (finalized by a tiny JAX reduction)
        psum_ref[0, 0] = jnp.broadcast_to(
            jnp.sum(acc, axis=0, keepdims=True), (8, Cout_p))
        psq_ref[0, 0] = jnp.broadcast_to(
            jnp.sum(acc * acc, axis=0, keepdims=True), (8, Cout_p))

    y, psum, psq = pl.pallas_call(
        conv_stats_kernel,
        grid=(N, R),
        in_specs=[
            # Whole padded image stays VMEM-resident across its row tiles
            # (one DMA per image since the block index only changes with n).
            # TODO(synk): for very large H*W*Cin switch to halo'd row-tile DMA
            # (pl.ANY + make_async_copy) to fit v7x's 64 MiB VMEM.
            pl.BlockSpec((1, Hp, Wp, Cin_p), lambda n, r: (n, 0, 0, 0)),
            # weight-stationary across the whole grid
            pl.BlockSpec((Kh * Kw, Cin_p, Cout_p), lambda n, r: (0, 0, 0)),
        ],
        out_specs=(
            pl.BlockSpec((1, TR, Wo, Cout_p), lambda n, r: (n, r, 0, 0)),
            pl.BlockSpec((1, 1, 8, Cout_p), lambda n, r: (n, r, 0, 0)),
            pl.BlockSpec((1, 1, 8, Cout_p), lambda n, r: (n, r, 0, 0)),
        ),
        out_shape=(
            jax.ShapeDtypeStruct((N, Ho, Wo, Cout_p), jnp.float32),
            jax.ShapeDtypeStruct((N, R, 8, Cout_p), jnp.float32),
            jax.ShapeDtypeStruct((N, R, 8, Cout_p), jnp.float32),
        ),
        compiler_params=pltpu.CompilerParams(
            dimension_semantics=("parallel", "parallel"),
            vmem_limit_bytes=32 * 1024 * 1024,
        ),
    )(x, w)

    # ---- tiny finalize on (Cout_p,) vectors: fold BN into one scale/shift ----
    m_total = float(N * Ho * Wo)
    ssum = jnp.sum(psum[:, :, 0, :], axis=(0, 1))
    ssq = jnp.sum(psq[:, :, 0, :], axis=(0, 1))
    mean = ssum / m_total
    var = jnp.maximum(ssq / m_total - mean * mean, 0.0)   # guard f32 cancellation
    gamma_p = jnp.pad(gamma.astype(jnp.float32), (0, Cout_p - Cout))
    beta_p = jnp.pad(beta.astype(jnp.float32), (0, Cout_p - Cout))
    scale = gamma_p * jax.lax.rsqrt(var + BN_EPS)
    shift = beta_p - mean * scale
    scale2d = scale.reshape(1, Cout_p)
    shift2d = shift.reshape(1, Cout_p)

    # ------------- pass 2: y*scale + shift + activation (lane-dense sweep) -------------
    def bn_act_kernel(y_ref, s_ref, b_ref, o_ref):
        yv = y_ref[...]
        s = s_ref[...].reshape(1, 1, 1, Cout_p)
        b = b_ref[...].reshape(1, 1, 1, Cout_p)
        o_ref[...] = _apply_activation(yv * s + b, activation).astype(o_ref.dtype)

    out = pl.pallas_call(
        bn_act_kernel,
        grid=(N, R),
        in_specs=[
            pl.BlockSpec((1, TR, Wo, Cout_p), lambda n, r: (n, r, 0, 0)),
            pl.BlockSpec((1, Cout_p), lambda n, r: (0, 0)),
            pl.BlockSpec((1, Cout_p), lambda n, r: (0, 0)),
        ],
        out_specs=pl.BlockSpec((1, TR, Wo, Cout_p), lambda n, r: (n, r, 0, 0)),
        out_shape=jax.ShapeDtypeStruct((N, Ho, Wo, Cout_p), jnp.float32),
        compiler_params=pltpu.CompilerParams(
            dimension_semantics=("parallel", "parallel"),
            vmem_limit_bytes=32 * 1024 * 1024,
        ),
    )(y, scale2d, shift2d)

    # (N, Ho, Wo, Cout_p) -> drop channel padding -> NCHW (module contract)
    return jnp.transpose(out[..., :Cout], (0, 3, 1, 2))


def _reference(x_nchw, weight, gamma, beta, *, stride=1):
    """Plain-JAX f32 reference of Conv2d(bias=False)+BN(train)+LeakyReLU(0.1)."""
    pad = (weight.shape[2] - 1) // 2
    y = jax.lax.conv_general_dilated(
        x_nchw, weight,
        window_strides=(stride, stride),
        padding=[(pad, pad), (pad, pad)],
        dimension_numbers=("NCHW", "OIHW", "NCHW"),
    )
    mean = jnp.mean(y, axis=(0, 2, 3), keepdims=True)
    var = jnp.mean((y - mean) ** 2, axis=(0, 2, 3), keepdims=True)
    y = (y - mean) * jax.lax.rsqrt(var + BN_EPS)
    y = y * gamma.reshape(1, -1, 1, 1) + beta.reshape(1, -1, 1, 1)
    return jnp.where(y > 0, y, LEAKY_SLOPE * y)


if __name__ == "__main__":
    # Conv_Bn_Activation(in_channels=4, out_channels=8, kernel_size=3, stride=1,
    #                    activation='leaky', bn=True, bias=False)
    N, Cin, H, W = 2, 4, 16, 16
    Cout, K, stride = 8, 3, 1

    key = jax.random.PRNGKey(0)
    kx, kw, kg, kb = jax.random.split(key, 4)
    x = jax.random.normal(kx, (N, Cin, H, W), dtype=jnp.float32)
    weight = 0.1 * jax.random.normal(kw, (Cout, Cin, K, K), dtype=jnp.float32)
    gamma = 1.0 + 0.05 * jax.random.normal(kg, (Cout,), dtype=jnp.float32)
    beta = 0.05 * jax.random.normal(kb, (Cout,), dtype=jnp.float32)

    fn = jax.jit(conv_bn_activation, static_argnames=("stride", "activation"))
    out = jax.block_until_ready(fn(x, weight, gamma, beta, stride=stride))

    ref = _reference(x, weight, gamma, beta, stride=stride)
    assert out.shape == (N, Cout, H, W)
    # bf16 MXU operands (f32 accumulation) -> slightly looser tolerance vs f32 ref
    assert jnp.allclose(out, ref, atol=2e-2, rtol=2e-2), \
        float(jnp.max(jnp.abs(out - ref)))

    print("KERNEL_OK")
</pallas_src>

<mosaic_0001>
module attributes {stable_mosaic.version = 11 : i64} {
  func.func @conv_stats_kernel(%arg0: i32, %arg1: i32, %arg2: memref<1x18x18x16xbf16, #tpu.memory_space<vmem>>, %arg3: memref<9x16x128xbf16, #tpu.memory_space<vmem>>, %arg4: memref<1x8x16x128xf32, #tpu.memory_space<vmem>>, %arg5: memref<1x1x8x128xf32, #tpu.memory_space<vmem>>, %arg6: memref<1x1x8x128xf32, #tpu.memory_space<vmem>>) attributes {dimension_semantics = [#tpu.dimension_semantics<parallel>, #tpu.dimension_semantics<parallel>], iteration_bounds = array<i64: 2, 2>, scalar_prefetch = 0 : i64, scratch_operands = 0 : i64, tpu.core_type = #tpu.core_type<tc>, window_params = [{transform_indices = @transform_0, window_bounds = array<i64: 1, 18, 18, 16>}, {pipeline_mode = #tpu.pipeline_mode<synchronous>, transform_indices = @transform_1, window_bounds = array<i64: 9, 16, 128>}, {transform_indices = @transform_2, window_bounds = array<i64: 1, 8, 16, 128>}, {transform_indices = @transform_3, window_bounds = array<i64: 1, 1, 8, 128>}, {transform_indices = @transform_4, window_bounds = array<i64: 1, 1, 8, 128>}]} {
    %c8_i32 = arith.constant 8 : i32
    %0 = arith.muli %arg1, %c8_i32 : i32
    %1 = tpu.assume_multiple %0, 8 : i32
    %c0 = arith.constant 0 : index
    %2 = arith.index_cast %1 : i32 to index
    %c0_0 = arith.constant 0 : index
    %c0_1 = arith.constant 0 : index
    %3 = vector.load %arg2[%c0, %2, %c0_0, %c0_1] : memref<1x18x18x16xbf16, #tpu.memory_space<vmem>>, vector<1x10x18x16xbf16>
    %4 = vector.shape_cast %3 : vector<1x10x18x16xbf16> to vector<10x18x16xbf16>
    %cst = arith.constant 0.000000e+00 : f32
    %5 = vector.broadcast %cst : f32 to vector<128x128xf32>
    %6 = vector.extract_strided_slice %4 {offsets = [0, 0, 0], sizes = [8, 16, 16], strides = [1, 1, 1]} : vector<10x18x16xbf16> to vector<8x16x16xbf16>
    %7 = vector.shape_cast %6 : vector<8x16x16xbf16> to vector<128x16xbf16>
    %c0_2 = arith.constant 0 : index
    %c0_3 = arith.constant 0 : index
    %c0_4 = arith.constant 0 : index
    %8 = vector.load %arg3[%c0_2, %c0_3, %c0_4] : memref<9x16x128xbf16, #tpu.memory_space<vmem>>, vector<1x16x128xbf16>
    %9 = vector.shape_cast %8 : vector<1x16x128xbf16> to vector<16x128xbf16>
    %cst_5 = arith.constant dense<0.000000e+00> : vector<128x128xf32>
    %10 = tpu.matmul %7, %9, %cst_5 {dimension_numbers = #tpu.dot_dimension_numbers<[1], [0], [0], [1], [0, 0, 1, 1], [], []>} : vector<128x16xbf16>, vector<16x128xbf16>, vector<128x128xf32> -> vector<128x128xf32>
    %11 = arith.addf %5, %10 : vector<128x128xf32>
    %12 = vector.extract_strided_slice %4 {offsets = [0, 1, 0], sizes = [8, 16, 16], strides = [1, 1, 1]} : vector<10x18x16xbf16> to vector<8x16x16xbf16>
    %13 = vector.shape_cast %12 : vector<8x16x16xbf16> to vector<128x16xbf16>
    %c1 = arith.constant 1 : index
    %c0_6 = arith.constant 0 : index
    %c0_7 = arith.constant 0 : index
    %14 = vector.load %arg3[%c1, %c0_6, %c0_7] : memref<9x16x128xbf16, #tpu.memory_space<vmem>>, vector<1x16x128xbf16>
    %15 = vector.shape_cast %14 : vector<1x16x128xbf16> to vector<16x128xbf16>
    %cst_8 = arith.constant dense<0.000000e+00> : vector<128x128xf32>
    %16 = tpu.matmul %13, %15, %cst_8 {dimension_numbers = #tpu.dot_dimension_numbers<[1], [0], [0], [1], [0, 0, 1, 1], [], []>} : vector<128x16xbf16>, vector<16x128xbf16>, vector<128x128xf32> -> vector<128x128xf32>
    %17 = arith.addf %11, %16 : vector<128x128xf32>
    %18 = vector.extract_strided_slice %4 {offsets = [0, 2, 0], sizes = [8, 16, 16], strides = [1, 1, 1]} : vector<10x18x16xbf16> to vector<8x16x16xbf16>
    %19 = vector.shape_cast %18 : vector<8x16x16xbf16> to vector<128x16xbf16>
    %c2 = arith.constant 2 : index
    %c0_9 = arith.constant 0 : index
    %c0_10 = arith.constant 0 : index
    %20 = vector.load %arg3[%c2, %c0_9, %c0_10] : memref<9x16x128xbf16, #tpu.memory_space<vmem>>, vector<1x16x128xbf16>
    %21 = vector.shape_cast %20 : vector<1x16x128xbf16> to vector<16x128xbf16>
    %cst_11 = arith.constant dense<0.000000e+00> : vector<128x128xf32>
    %22 = tpu.matmul %19, %21, %cst_11 {dimension_numbers = #tpu.dot_dimension_numbers<[1], [0], [0], [1], [0, 0, 1, 1], [], []>} : vector<128x16xbf16>, vector<16x128xbf16>, vector<128x128xf32> -> vector<128x128xf32>
    %23 = arith.addf %17, %22 : vector<128x128xf32>
    %24 = vector.extract_strided_slice %4 {offsets = [1, 0, 0], sizes = [8, 16, 16], strides = [1, 1, 1]} : vector<10x18x16xbf16> to vector<8x16x16xbf16>
    %25 = vector.shape_cast %24 : vector<8x16x16xbf16> to vector<128x16xbf16>
    %c3 = arith.constant 3 : index
    %c0_12 = arith.constant 0 : index
    %c0_13 = arith.constant 0 : index
    %26 = vector.load %arg3[%c3, %c0_12, %c0_13] : memref<9x16x128xbf16, #tpu.memory_space<vmem>>, vector<1x16x128xbf16>
    %27 = vector.shape_cast %26 : vector<1x16x128xbf16> to vector<16x128xbf16>
    %cst_14 = arith.constant dense<0.000000e+00> : vector<128x128xf32>
    %28 = tpu.matmul %25, %27, %cst_14 {dimension_numbers = #tpu.dot_dimension_numbers<[1], [0], [0], [1], [0, 0, 1, 1], [], []>} : vector<128x16xbf16>, vector<16x128xbf16>, vector<128x128xf32> -> vector<128x128xf32>
    %29 = arith.addf %23, %28 : vector<128x128xf32>
    %30 = vector.extract_strided_slice %4 {offsets = [1, 1, 0], sizes = [8, 16, 16], strides = [1, 1, 1]} : vector<10x18x16xbf16> to vector<8x16x16xbf16>
    %31 = vector.shape_cast %30 : vector<8x16x16xbf16> to vector<128x16xbf16>
    %c4 = arith.constant 4 : index
    %c0_15 = arith.constant 0 : index
    %c0_16 = arith.constant 0 : index
    %32 = vector.load %arg3[%c4, %c0_15, %c0_16] : memref<9x16x128xbf16, #tpu.memory_space<vmem>>, vector<1x16x128xbf16>
    %33 = vector.shape_cast %32 : vector<1x16x128xbf16> to vector<16x128xbf16>
    %cst_17 = arith.constant dense<0.000000e+00> : vector<128x128xf32>
    %34 = tpu.matmul %31, %33, %cst_17 {dimension_numbers = #tpu.dot_dimension_numbers<[1], [0], [0], [1], [0, 0, 1, 1], [], []>} : vector<128x16xbf16>, vector<16x128xbf16>, vector<128x128xf32> -> vector<128x128xf32>
    %35 = arith.addf %29, %34 : vector<128x128xf32>
    %36 = vector.extract_strided_slice %4 {offsets = [1, 2, 0], sizes = [8, 16, 16], strides = [1, 1, 1]} : vector<10x18x16xbf16> to vector<8x16x16xbf16>
    %37 = vector.shape_cast %36 : vector<8x16x16xbf16> to vector<128x16xbf16>
    %c5 = arith.constant 5 : index
    %c0_18 = arith.constant 0 : index
    %c0_19 = arith.constant 0 : index
    %38 = vector.load %arg3[%c5, %c0_18, %c0_19] : memref<9x16x128xbf16, #tpu.memory_space<vmem>>, vector<1x16x128xbf16>
    %39 = vector.shape_cast %38 : vector<1x16x128xbf16> to vector<16x128xbf16>
    %cst_20 = arith.constant dense<0.000000e+00> : vector<128x128xf32>
    %40 = tpu.matmul %37, %39, %cst_20 {dimension_numbers = #tpu.dot_dimension_numbers<[1], [0], [0], [1], [0, 0, 1, 1], [], []>} : vector<128x16xbf16>, vector<16x128xbf16>, vector<128x128xf32> -> vector<128x128xf32>
    %41 = arith.addf %35, %40 : vector<128x128xf32>
    %42 = vector.extract_strided_slice %4 {offsets = [2, 0, 0], sizes = [8, 16, 16], strides = [1, 1, 1]} : vector<10x18x16xbf16> to vector<8x16x16xbf16>
    %43 = vector.shape_cast %42 : vector<8x16x16xbf16> to vector<128x16xbf16>
    %c6 = arith.constant 6 : index
    %c0_21 = arith.constant 0 : index
    %c0_22 = arith.constant 0 : index
    %44 = vector.load %arg3[%c6, %c0_21, %c0_22] : memref<9x16x128xbf16, #tpu.memory_space<vmem>>, vector<1x16x128xbf16>
    %45 = vector.shape_cast %44 : vector<1x16x128xbf16> to vector<16x128xbf16>
    %cst_23 = arith.constant dense<0.000000e+00> : vector<128x128xf32>
    %46 = tpu.matmul %43, %45, %cst_23 {dimension_numbers = #tpu.dot_dimension_numbers<[1], [0], [0], [1], [0, 0, 1, 1], [], []>} : vector<128x16xbf16>, vector<16x128xbf16>, vector<128x128xf32> -> vector<128x128xf32>
    %47 = arith.addf %41, %46 : vector<128x128xf32>
    %48 = vector.extract_strided_slice %4 {offsets = [2, 1, 0], sizes = [8, 16, 16], strides = [1, 1, 1]} : vector<10x18x16xbf16> to vector<8x16x16xbf16>
    %49 = vector.shape_cast %48 : vector<8x16x16xbf16> to vector<128x16xbf16>
    %c7 = arith.constant 7 : index
    %c0_24 = arith.constant 0 : index
    %c0_25 = arith.constant 0 : index
    %50 = vector.load %arg3[%c7, %c0_24, %c0_25] : memref<9x16x128xbf16, #tpu.memory_space<vmem>>, vector<1x16x128xbf16>
    %51 = vector.shape_cast %50 : vector<1x16x128xbf16> to vector<16x128xbf16>
    %cst_26 = arith.constant dense<0.000000e+00> : vector<128x128xf32>
    %52 = tpu.matmul %49, %51, %cst_26 {dimension_numbers = #tpu.dot_dimension_numbers<[1], [0], [0], [1], [0, 0, 1, 1], [], []>} : vector<128x16xbf16>, vector<16x128xbf16>, vector<128x128xf32> -> vector<128x128xf32>
    %53 = arith.addf %47, %52 : vector<128x128xf32>
    %54 = vector.extract_strided_slice %4 {offsets = [2, 2, 0], sizes = [8, 16, 16], strides = [1, 1, 1]} : vector<10x18x16xbf16> to vector<8x16x16xbf16>
    %55 = vector.shape_cast %54 : vector<8x16x16xbf16> to vector<128x16xbf16>
    %c8 = arith.constant 8 : index
    %c0_27 = arith.constant 0 : index
    %c0_28 = arith.constant 0 : index
    %56 = vector.load %arg3[%c8, %c0_27, %c0_28] : memref<9x16x128xbf16, #tpu.memory_space<vmem>>, vector<1x16x128xbf16>
    %57 = vector.shape_cast %56 : vector<1x16x128xbf16> to vector<16x128xbf16>
    %cst_29 = arith.constant dense<0.000000e+00> : vector<128x128xf32>
    %58 = tpu.matmul %55, %57, %cst_29 {dimension_numbers = #tpu.dot_dimension_numbers<[1], [0], [0], [1], [0, 0, 1, 1], [], []>} : vector<128x16xbf16>, vector<16x128xbf16>, vector<128x128xf32> -> vector<128x128xf32>
    %59 = arith.addf %53, %58 : vector<128x128xf32>
    %60 = vector.shape_cast %59 : vector<128x128xf32> to vector<8x16x128xf32>
    %c0_30 = arith.constant 0 : index
    %c0_31 = arith.constant 0 : index
    %c0_32 = arith.constant 0 : index
    %c0_33 = arith.constant 0 : index
    %61 = vector.load %arg4[%c0_30, %c0_31, %c0_32, %c0_33] : memref<1x8x16x128xf32, #tpu.memory_space<vmem>>, vector<1x8x16x128xf32>
    %62 = vector.shape_cast %61 : vector<1x8x16x128xf32> to vector<8x16x128xf32>
    %63 = vector.shape_cast %60 : vector<8x16x128xf32> to vector<1x8x16x128xf32>
    tpu.vector_store %arg4[%c0_30, %c0_31, %c0_32, %c0_33], %63 {strides = array<i32>} : memref<1x8x16x128xf32, #tpu.memory_space<vmem>>, vector<1x8x16x128xf32>,
    %cst_34 = arith.constant dense<0.000000e+00> : vector<128xf32>
    %64 = vector.multi_reduction <add>, %59, %cst_34 [0] : vector<128x128xf32> to vector<128xf32>
    %65 = vector.shape_cast %64 : vector<128xf32> to vector<1x128xf32>
    %66 = vector.shape_cast %65 : vector<1x128xf32> to vector<1x128xf32>
    %67 = vector.broadcast %66 : vector<1x128xf32> to vector<8x128xf32>
    %c0_35 = arith.constant 0 : index
    %c0_36 = arith.constant 0 : index
    %c0_37 = arith.constant 0 : index
    %c0_38 = arith.constant 0 : index
    %68 = vector.load %arg5[%c0_35, %c0_36, %c0_37, %c0_38] : memref<1x1x8x128xf32, #tpu.memory_space<vmem>>, vector<1x1x8x128xf32>
    %69 = vector.shape_cast %68 : vector<1x1x8x128xf32> to vector<8x128xf32>
    %70 = vector.shape_cast %67 : vector<8x128xf32> to vector<1x1x8x128xf32>
    tpu.vector_store %arg5[%c0_35, %c0_36, %c0_37, %c0_38], %70 {strides = array<i32>} : memref<1x1x8x128xf32, #tpu.memory_space<vmem>>, vector<1x1x8x128xf32>,
    %71 = arith.mulf %59, %59 : vector<128x128xf32>
    %cst_39 = arith.constant dense<0.000000e+00> : vector<128xf32>
    %72 = vector.multi_reduction <add>, %71, %cst_39 [0] : vector<128x128xf32> to vector<128xf32>
    %73 = vector.shape_cast %72 : vector<128xf32> to vector<1x128xf32>
    %74 = vector.shape_cast %73 : vector<1x128xf32> to vector<1x128xf32>
    %75 = vector.broadcast %74 : vector<1x128xf32> to vector<8x128xf32>
    %c0_40 = arith.constant 0 : index
    %c0_41 = arith.constant 0 : index
    %c0_42 = arith.constant 0 : index
    %c0_43 = arith.constant 0 : index
    %76 = vector.load %arg6[%c0_40, %c0_41, %c0_42, %c0_43] : memref<1x1x8x128xf32, #tpu.memory_space<vmem>>, vector<1x1x8x128xf32>
    %77 = vector.shape_cast %76 : vector<1x1x8x128xf32> to vector<8x128xf32>
    %78 = vector.shape_cast %75 : vector<8x128xf32> to vector<1x1x8x128xf32>
    tpu.vector_store %arg6[%c0_40, %c0_41, %c0_42, %c0_43], %78 {strides = array<i32>} : memref<1x1x8x128xf32, #tpu.memory_space<vmem>>, vector<1x1x8x128xf32>,
    return
  }
  func.func @transform_0(%arg0: i32, %arg1: i32) -> (i32, i32, i32, i32) {
    %c0_i32 = arith.constant 0 : i32
    %c0_i32_0 = arith.constant 0 : i32
    %c0_i32_1 = arith.constant 0 : i32
    %c0_i32_2 = arith.constant 0 : i32
    return %arg0, %c0_i32, %c0_i32_0, %c0_i32_1 : i32, i32, i32, i32
  }
  func.func @transform_1(%arg0: i32, %arg1: i32) -> (i32, i32, i32) {
    %c0_i32 = arith.constant 0 : i32
    %c0_i32_0 = arith.constant 0 : i32
    %c0_i32_1 = arith.constant 0 : i32
    %c0_i32_2 = arith.constant 0 : i32
    return %c0_i32, %c0_i32_0, %c0_i32_1 : i32, i32, i32
  }
  func.func @transform_2(%arg0: i32, %arg1: i32) -> (i32, i32, i32, i32) {
    %c0_i32 = arith.constant 0 : i32
    %c0_i32_0 = arith.constant 0 : i32
    %c0_i32_1 = arith.constant 0 : i32
    return %arg0, %arg1, %c0_i32, %c0_i32_0 : i32, i32, i32, i32
  }
  func.func @transform_3(%arg0: i32, %arg1: i32) -> (i32, i32, i32, i32) {
    %c0_i32 = arith.constant 0 : i32
    %c0_i32_0 = arith.constant 0 : i32
    %c0_i32_1 = arith.constant 0 : i32
    return %arg0, %arg1, %c0_i32, %c0_i32_0 : i32, i32, i32, i32
  }
  func.func @transform_4(%arg0: i32, %arg1: i32) -> (i32, i32, i32, i32) {
    %c0_i32 = arith.constant 0 : i32
    %c0_i32_0 = arith.constant 0 : i32
    %c0_i32_1 = arith.constant 0 : i32
    return %arg0, %arg1, %c0_i32, %c0_i32_0 : i32, i32, i32, i32
  }
}

module attributes {stable_mosaic.version = 11 : i64} {
  func.func @bn_act_kernel(%arg0: i32, %arg1: i32, %arg2: memref<1x8x16x128xf32, #tpu.memory_space<vmem>>, %arg3: memref<1x128xf32, #tpu.memory_space<vmem>>, %arg4: memref<1x128xf32, #tpu.memory_space<vmem>>, %arg5: memref<1x8x16x128xf32, #tpu.memory_space<vmem>>) attributes {dimension_semantics = [#tpu.dimension_semantics<parallel>, #tpu.dimension_semantics<parallel>], iteration_bounds = array<i64: 2, 2>, scalar_prefetch = 0 : i64, scratch_operands = 0 : i64, tpu.core_type = #tpu.core_type<tc>, window_params = [{transform_indices = @transform_0, window_bounds = array<i64: 1, 8, 16, 128>}, {pipeline_mode = #tpu.pipeline_mode<synchronous>, transform_indices = @transform_1, window_bounds = array<i64: 1, 128>}, {pipeline_mode = #tpu.pipeline_mode<synchronous>, transform_indices = @transform_2, window_bounds = array<i64: 1, 128>}, {transform_indices = @transform_3, window_bounds = array<i64: 1, 8, 16, 128>}]} {
    %c0 = arith.constant 0 : index
    %c0_0 = arith.constant 0 : index
    %c0_1 = arith.constant 0 : index
    %c0_2 = arith.constant 0 : index
    %0 = vector.load %arg2[%c0, %c0_0, %c0_1, %c0_2] : memref<1x8x16x128xf32, #tpu.memory_space<vmem>>, vector<1x8x16x128xf32>
    %c0_3 = arith.constant 0 : index
    %c0_4 = arith.constant 0 : index
    %1 = vector.load %arg3[%c0_3, %c0_4] : memref<1x128xf32, #tpu.memory_space<vmem>>, vector<1x128xf32>
    %2 = vector.shape_cast %1 : vector<1x128xf32> to vector<1x1x1x128xf32>
    %c0_5 = arith.constant 0 : index
    %c0_6 = arith.constant 0 : index
    %3 = vector.load %arg4[%c0_5, %c0_6] : memref<1x128xf32, #tpu.memory_space<vmem>>, vector<1x128xf32>
    %4 = vector.shape_cast %3 : vector<1x128xf32> to vector<1x1x1x128xf32>
    %5 = vector.broadcast %2 : vector<1x1x1x128xf32> to vector<1x8x16x128xf32>
    %6 = arith.mulf %0, %5 : vector<1x8x16x128xf32>
    %7 = vector.broadcast %4 : vector<1x1x1x128xf32> to vector<1x8x16x128xf32>
    %8 = arith.addf %6, %7 : vector<1x8x16x128xf32>
    %cst = arith.constant 0.000000e+00 : f32
    %9 = vector.broadcast %cst : f32 to vector<1x8x16x128xf32>
    %10 = arith.cmpf ogt, %8, %9 : vector<1x8x16x128xf32>
    %cst_7 = arith.constant 1.000000e-01 : f32
    %11 = vector.broadcast %cst_7 : f32 to vector<1x8x16x128xf32>
    %12 = arith.mulf %11, %8 : vector<1x8x16x128xf32>
    %13 = arith.select %10, %8, %12 : vector<1x8x16x128xi1>, vector<1x8x16x128xf32>
    %c0_8 = arith.constant 0 : index
    %c0_9 = arith.constant 0 : index
    %c0_10 = arith.constant 0 : index
    %c0_11 = arith.constant 0 : index
    %14 = vector.load %arg5[%c0_8, %c0_9, %c0_10, %c0_11] : memref<1x8x16x128xf32, #tpu.memory_space<vmem>>, vector<1x8x16x128xf32>
    tpu.vector_store %arg5[%c0_8, %c0_9, %c0_10, %c0_11], %13 {strides = array<i32>} : memref<1x8x16x128xf32, #tpu.memory_space<vmem>>, vector<1x8x16x128xf32>,
    return
  }
  func.func @transform_0(%arg0: i32, %arg1: i32) -> (i32, i32, i32, i32) {
    %c0_i32 = arith.constant 0 : i32
    %c0_i32_0 = arith.constant 0 : i32
    %c0_i32_1 = arith.constant 0 : i32
    return %arg0, %arg1, %c0_i32, %c0_i32_0 : i32, i32, i32, i32
  }
  func.func @transform_1(%arg0: i32, %arg1: i32) -> (i32, i32) {
    %c0_i32 = arith.constant 0 : i32
    %c0_i32_0 = arith.constant 0 : i32
    %c0_i32_1 = arith.constant 0 : i32
    return %c0_i32, %c0_i32_0 : i32, i32
  }
  func.func @transform_2(%arg0: i32, %arg1: i32) -> (i32, i32) {
    %c0_i32 = arith.constant 0 : i32
    %c0_i32_0 = arith.constant 0 : i32
    %c0_i32_1 = arith.constant 0 : i32
    return %c0_i32, %c0_i32_0 : i32, i32
  }
  func.func @transform_3(%arg0: i32, %arg1: i32) -> (i32, i32, i32, i32) {
    %c0_i32 = arith.constant 0 : i32
    %c0_i32_0 = arith.constant 0 : i32
    %c0_i32_1 = arith.constant 0 : i32
    return %arg0, %arg1, %c0_i32, %c0_i32_0 : i32, i32, i32, i32
  }
}

</mosaic_0001>

<bundles_post_ra>
// kernel: conv_bn_activation.3
= control target key start
LH: loop header
LB: loop body
LE: loop exit
PB: predicated region body
PF: predicated region fallthrough
CT: control target
= control target key end

     0   :  { %s557_s12 = smov 0   ;;  %s559_s13 = smov 0   ;;  %s689_s0 = inlined_call_operand.vmem [shape: f32[2,16,16,128], index: 0, kind: input, shape index: {}]   ;;  %s690_s1 = inlined_call_operand.vmem [shape: f32[1,128], index: 1, kind: input, shape index: {}]   ;;  %s691_s2 = inlined_call_operand.vmem [shape: f32[1,128], index: 2, kind: input, shape index: {}]   ;;  %s692_s3 = inlined_call_operand.vmem [shape: f32[2,16,16,128], index: 3, kind: output, shape index: {}]  }
   0x1   :  { %s561_s14 = smov 0   ;;  %s563_s15 = smov 0  }
   0x2   :  { %s565_s16 = smov 0  }
   0x3 LB: > { %s22_s17 = sadd.s32 1, %s527_s14  ;;  %s25_s18 = sadd.s32 1, %s531_s15  ;;  %s535_s16 = sphi %s565_s16, %s13_s16   ;;  %s531_s15 = sphi %s563_s15, %s696_s15   ;;  %s527_s14 = sphi %s561_s14, %s695_s14   ;;  %s523_s13 = sphi %s559_s13, %s694_s13   ;;  %s519_s12 = sphi %s557_s12, %s693_s12  }
   0x4   : > { %p23_p0 = scmp.ge.s32.totalorder %s22_s17, 2  ;;  %p444_p1 = scmp.ge.s32.totalorder %s535_s16, 1 }
   0x5   : > { %p159_p2 = scmp.lt.s32.totalorder %s535_s16, 5 }
   0x6   : > { %s698_s17 = smov (%p23_p0, %s22_s17), 0  ;;  %s700_s18 = smov (!%p23_p0, %s25_s18), %s531_s15 }
   0x7   : > { %p160_p3 = pnand %p444_p1, %p159_p2  ;;  %p27_p4 = scmp.ge.s32.totalorder %s700_s18, 2 }
   0x8   : > { %s445_s19 = sshll.u32 (!%p160_p3), %s519_s12, 3  ;;  %p194_p5 = scmp.lt.s32.totalorder (!%p160_p3), %s523_s13, 1  ;;  %v593_v0 = vld [vmem:[%s690_s1] ss:$0 sm:$0xff] (!%p160_p3) }
   0x9   : > { %s702_s18 = smov (%p27_p4, %s700_s18), 0  ;;  %163 = sbr.rel (%p160_p3) target bundleno = 47 (0x2f), region = 32 }
   0xa   : > { %p196_p6 = scmp.lt.s32.totalorder (!%p160_p3), %s445_s19, 15  ;;  %v603_v1 = vld [vmem:[%s691_s2] ss:$0 sm:$0xff] (!%p160_p3) }
  0x10   : > { %s704_s13 = smov (!%p194_p5, %s523_s13), 1  ;;  %s706_s19 = smov (!%p196_p6, %s445_s19), 15 }
  0x11   : > { %s447_s20 = sshll.u32 %s704_s13, 5  ;;  %s446_s21 = sshll.u32 %s706_s19, 1 }
  0x12   : > { %s587_s22 = sadd.s32 %s447_s20, %s446_s21 }
  0x13   : > { %s448_s23 = sshll.u32 %s587_s22, 3 }
  0x14   : > { %s598_s28 = scalar_lea.vmem %s689_s0, %s448_s23  ;;  %s631_s6 = scalar_lea.vmem %s692_s3, %s448_s23 }
  0x15   : > { %v215_v2 = vld [vmem:[%s598_s28] sm:$0xff]  ;;  %v216_v3 = vld [vmem:[%s598_s28 + $0x8] sm:$0xff]  ;;  %v217_v4 = vld [vmem:[%s598_s28 + $0x10] sm:$0xff] }
  0x16   : > { %v239_v5 = vmul.f32 %v593_v0, %v215_v2  ;;  %v240_v6 = vmul.f32 %v593_v0, %v216_v3  ;;  %v241_v7 = vmul.f32 %v593_v0, %v217_v4  ;;  %v218_v8 = vld [vmem:[%s598_s28 + $0x18] sm:$0xff]  ;;  %v219_v9 = vld [vmem:[%s598_s28 + $0x20] sm:$0xff]  ;;  %v220_v10 = vld [vmem:[%s598_s28 + $0x28] sm:$0xff] }
  0x17   : > { %v242_v11 = vmul.f32 %v593_v0, %v218_v8  ;;  %v243_v12 = vmul.f32 %v593_v0, %v219_v9  ;;  %v244_v13 = vmul.f32 %v593_v0, %v220_v10  ;;  %v221_v14 = vld [vmem:[%s598_s28 + $0x30] sm:$0xff]  ;;  %v222_v15 = vld [vmem:[%s598_s28 + $0x38] sm:$0xff]  ;;  %v223_v24 = vld [vmem:[%s598_s28 + $0x40] sm:$0xff] }
  0x18   : > { %v261_v16 = vadd.f32 %v603_v1, %v239_v5  ;;  %v262_v17 = vadd.f32 %v603_v1, %v240_v6  ;;  %v263_v18 = vadd.f32 %v603_v1, %v241_v7  ;;  %v245_v19 = vmul.f32 %v593_v0, %v221_v14  ;;  %v224_v32 = vld [vmem:[%s598_s28 + $0x48] sm:$0xff]  ;;  %v225_v33 = vld [vmem:[%s598_s28 + $0x50] sm:$0xff]  ;;  %v226_v34 = vld [vmem:[%s598_s28 + $0x58] sm:$0xff] }
  0x19   : > { %v264_v20 = vadd.f32 %v603_v1, %v242_v11  ;;  %v265_v21 = vadd.f32 %v603_v1, %v243_v12  ;;  %v266_v22 = vadd.f32 %v603_v1, %v244_v13  ;;  %v246_v23 = vmul.f32 %v593_v0, %v222_v15  ;;  %v227_v46 = vld [vmem:[%s598_s28 + $0x60] sm:$0xff]  ;;  %v228_v47 = vld [vmem:[%s598_s28 + $0x68] sm:$0xff]  ;;  %v229_v58 = vld [vmem:[%s598_s28 + $0x70] sm:$0xff] }
  0x1a   : > { %vm277_vm0 = vcmp.gt.f32.partialorder %v261_v16, 0.0  ;;  %v293_v25 = vmul.f32 0.1, %v261_v16  ;;  %vm278_vm1 = vcmp.gt.f32.partialorder %v262_v17, 0.0  ;;  %v294_v26 = vmul.f32 0.1, %v262_v17 }
  0x1b   : > { %vm279_vm2 = vcmp.gt.f32.partialorder %v263_v18, 0.0  ;;  %v295_v27 = vmul.f32 0.1, %v263_v18  ;;  %vm280_vm3 = vcmp.gt.f32.partialorder %v264_v20, 0.0  ;;  %v296_v28 = vmul.f32 0.1, %v264_v20 }
  0x1c   : > { %v309_v29 = vsel %vm277_vm0, %v261_v16, %v293_v25  ;;  %v310_v30 = vsel %vm278_vm1, %v262_v17, %v294_v26  ;;  %vm281_vm4 = vcmp.gt.f32.partialorder %v265_v21, 0.0  ;;  %v297_v31 = vmul.f32 0.1, %v265_v21  ;;  %v230_v59 = vld [vmem:[%s598_s28 + $0x78] sm:$0xff] }
  0x1d   : > { %325 = vst [vmem:[%s631_s6] sm:$0xff] %v309_v29  ;;  %326 = vst [vmem:[%s631_s6 + $0x8] sm:$0xff] %v310_v30  ;;  %v311_v35 = vsel %vm279_vm2, %v263_v18, %v295_v27  ;;  %v312_v36 = vsel %vm280_vm3, %v264_v20, %v296_v28  ;;  %vm282_vm5 = vcmp.gt.f32.partialorder %v266_v22, 0.0  ;;  %v298_v37 = vmul.f32 0.1, %v266_v22 }
  0x1e   : > { %327 = vst [vmem:[%s631_s6 + $0x10] sm:$0xff] %v311_v35  ;;  %328 = vst [vmem:[%s631_s6 + $0x18] sm:$0xff] %v312_v36  ;;  %v313_v38 = vsel %vm281_vm4, %v265_v21, %v297_v31  ;;  %v267_v39 = vadd.f32 %v603_v1, %v245_v19  ;;  %v268_v40 = vadd.f32 %v603_v1, %v246_v23 }
  0x1f   : > { %v247_v41 = vmul.f32 %v593_v0, %v223_v24  ;;  %329 = vst [vmem:[%s631_s6 + $0x20] sm:$0xff] %v313_v38  ;;  %v314_v42 = vsel %vm282_vm5, %v266_v22, %v298_v37  ;;  %v248_v43 = vmul.f32 %v593_v0, %v224_v32  ;;  %v249_v44 = vmul.f32 %v593_v0, %v225_v33 }
  0x20   : > { %v250_v45 = vmul.f32 %v593_v0, %v226_v34  ;;  %330 = vst [vmem:[%s631_s6 + $0x28] sm:$0xff] %v314_v42  ;;  %vm283_vm6 = vcmp.gt.f32.partialorder %v267_v39, 0.0  ;;  %v299_v48 = vmul.f32 0.1, %v267_v39  ;;  %vm284_vm7 = vcmp.gt.f32.partialorder %v268_v40, 0.0 }
  0x21   : > { %v300_v49 = vmul.f32 0.1, %v268_v40  ;;  %v269_v50 = vadd.f32 %v603_v1, %v247_v41  ;;  %v270_v51 = vadd.f32 %v603_v1, %v248_v43  ;;  %v271_v52 = vadd.f32 %v603_v1, %v249_v44 }
  0x22   : > { %v272_v53 = vadd.f32 %v603_v1, %v250_v45  ;;  %v315_v54 = vsel %vm283_vm6, %v267_v39, %v299_v48  ;;  %v251_v56 = vmul.f32 %v593_v0, %v227_v46  ;;  %v252_v57 = vmul.f32 %v593_v0, %v228_v47 }
  0x23   : > { %v316_v55 = vsel %vm284_vm7, %v268_v40, %v300_v49  ;;  %331 = vst [vmem:[%s631_s6 + $0x30] sm:$0xff] %v315_v54  ;;  %vm285_vm8 = vcmp.gt.f32.partialorder %v269_v50, 0.0  ;;  %v301_v60 = vmul.f32 0.1, %v269_v50  ;;  %vm286_vm9 = vcmp.gt.f32.partialorder %v270_v51, 0.0 }
  0x24   : > { %332 = vst [vmem:[%s631_s6 + $0x38] sm:$0xff] %v316_v55  ;;  %v302_v61 = vmul.f32 0.1, %v270_v51  ;;  %vm287_vm10 = vcmp.gt.f32.partialorder %v271_v52, 0.0  ;;  %v303_v62 = vmul.f32 0.1, %v271_v52  ;;  %v273_v4 = vadd.f32 %v603_v1, %v251_v56 }
  0x25   : > { %vm288_vm11 = vcmp.gt.f32.partialorder %v272_v53, 0.0  ;;  %v304_v63 = vmul.f32 0.1, %v272_v53  ;;  %v317_v2 = vsel %vm285_vm8, %v269_v50, %v301_v60  ;;  %v274_v5 = vadd.f32 %v603_v1, %v252_v57 }
  0x26   : > { %v318_v3 = vsel %vm286_vm9, %v270_v51, %v302_v61  ;;  %333 = vst [vmem:[%s631_s6 + $0x40] sm:$0xff] %v317_v2  ;;  %v319_v6 = vsel %vm287_vm10, %v271_v52, %v303_v62  ;;  %v253_v8 = vmul.f32 %v593_v0, %v229_v58  ;;  %v254_v9 = vmul.f32 %v593_v0, %v230_v59 }
  0x27   : > { %334 = vst [vmem:[%s631_s6 + $0x48] sm:$0xff] %v318_v3  ;;  %v320_v7 = vsel %vm288_vm11, %v272_v53, %v304_v63  ;;  %335 = vst [vmem:[%s631_s6 + $0x50] sm:$0xff] %v319_v6  ;;  %vm289_vm12 = vcmp.gt.f32.partialorder %v273_v4, 0.0  ;;  %v305_v10 = vmul.f32 0.1, %v273_v4  ;;  %vm290_vm13 = vcmp.gt.f32.partialorder %v274_v5, 0.0 }
  0x28   : > { %336 = vst [vmem:[%s631_s6 + $0x58] sm:$0xff] %v320_v7  ;;  %v306_v11 = vmul.f32 0.1, %v274_v5  ;;  %v275_v12 = vadd.f32 %v603_v1, %v253_v8  ;;  %v276_v13 = vadd.f32 %v603_v1, %v254_v9 }
  0x29   : > { %v321_v14 = vsel %vm289_vm12, %v273_v4, %v305_v10 }
  0x2a   : > { %v322_v15 = vsel %vm290_vm13, %v274_v5, %v306_v11  ;;  %337 = vst [vmem:[%s631_s6 + $0x60] sm:$0xff] %v321_v14  ;;  %vm291_vm14 = vcmp.gt.f32.partialorder %v275_v12, 0.0  ;;  %v307_v16 = vmul.f32 0.1, %v275_v12  ;;  %vm292_vm15 = vcmp.gt.f32.partialorder %v276_v13, 0.0 }
  0x2b   : > { %338 = vst [vmem:[%s631_s6 + $0x68] sm:$0xff] %v322_v15  ;;  %v308_v0 = vmul.f32 0.1, %v276_v13 }
  0x2c   : > { %v323_v17 = vsel %vm291_vm14, %v275_v12, %v307_v16 }
  0x2d   : > { %v324_v18 = vsel %vm292_vm15, %v276_v13, %v308_v0  ;;  %339 = vst [vmem:[%s631_s6 + $0x70] sm:$0xff] %v323_v17 }
  0x2e   : > { %340 = vst [vmem:[%s631_s6 + $0x78] sm:$0xff] %v324_v18 }
  0x2f PF: > { %s13_s16 = sadd.s32 1, %s535_s16   ;;  %s693_s12 = smov %s527_s14 }
  0x30   : > { %p10_p7 = scmp.ge.s32.totalorder %s13_s16, 6   ;;  %s694_s13 = smov %s531_s15 }
  0x31   : > { %s695_s14 = smov %s698_s17  ;;  %s696_s15 = smov %s702_s18 }
  0x32   :  { %12 = sbr.rel (!%p10_p7) target bundleno = 3 (0x3), region = 62 }

// kernel: conv_bn_activation.2
= control target key start
LH: loop header
LB: loop body
LE: loop exit
PB: predicated region body
PF: predicated region fallthrough
CT: control target
= control target key end

     0   :  { %s2808_s15 = smov 0   ;;  %s2810_s16 = smov 0   ;;  %s3403_s0 = inlined_call_operand.vmem [shape: bf16[2,18,18,16], index: 0, kind: input, shape index: {}]   ;;  %s3404_s1 = inlined_call_operand.vmem [shape: bf16[9,16,128], index: 1, kind: input, shape index: {}]   ;;  %s3405_s2 = inlined_call_operand.vmem [shape: f32[2,16,16,128], index: 2, kind: output, shape index: {0}]   ;;  %s3406_s3 = inlined_call_operand.vmem [shape: f32[2,2,8,128], index: 3, kind: output, shape index: {1}]   ;;  %s3407_s4 = inlined_call_operand.vmem [shape: f32[2,2,8,128], index: 4, kind: output, shape index: {2}]  }
   0x1   :  { %s2812_s17 = smov 0   ;;  %s2814_s18 = smov 0  }
   0x2   :  { %s2816_s19 = smov 0  }
   0x3 LB: > { %s24_s20 = sadd.s32 1, %s2773_s17  ;;  %s27_s21 = sadd.s32 1, %s2777_s18  ;;  %s2781_s19 = sphi %s2816_s19, %s15_s19   ;;  %s2777_s18 = sphi %s2814_s18, %s3415_s18   ;;  %s2773_s17 = sphi %s2812_s17, %s3414_s17   ;;  %s2769_s16 = sphi %s2810_s16, %s3413_s16   ;;  %s2765_s15 = sphi %s2808_s15, %s3412_s15  }
   0x4   : > { %p25_p0 = scmp.ge.s32.totalorder %s24_s20, 2  ;;  %p2157_p1 = scmp.ge.s32.totalorder %s2781_s19, 1 }
   0x5   : > { %p185_p2 = scmp.lt.s32.totalorder %s2781_s19, 5 }
   0x6   : > { %s3417_s20 = smov (%p25_p0, %s24_s20), 0  ;;  %s3419_s21 = smov (!%p25_p0, %s27_s21), %s2777_s18 }
   0x7   : > { %p186_p3 = pnand %p2157_p1, %p185_p2  ;;  %p29_p4 = scmp.ge.s32.totalorder %s3419_s21, 2 }
   0x8   : > { %v2724_v0 = vld [vmem:[%s3404_s1 + $0x8] sm:$0xff] (!%p186_p3)   ;;  %p232_p5 = scmp.lt.s32.totalorder (!%p186_p3), %s2769_s16, 1  ;;  %v2846_v1 = vld [vmem:[%s3404_s1 + $0x20] sm:$0xff] (!%p186_p3)   ;;  %s2309_s26 = smul.u32 (!%p186_p3), 96, %s2765_s15  ;;  %vm301_vm0 = vsmask.f32 (!%p186_p3), 3328 }
   0x9   : > { %s3421_s21 = smov (%p29_p4, %s3419_s21), 0  ;;  %189 = sbr.rel (%p186_p3) target bundleno = 418 (0x1a2), region = 28 }
   0xa   : > { %2391 = vmatprep.subr.bf16.mxu1 (!%p186_p3), %v2724_v0  ;;  %2463 = vmatprep.subr.bf16.mxu0 (!%p186_p3), %v2846_v1  ;;  %v2857_v2 = vld [vmem:[%s3404_s1] sm:$0xff] (!%p186_p3)   ;;  %v2862_v3 = vld [vmem:[%s3404_s1 + $0x28] sm:$0xff] (!%p186_p3)   ;;  %vm302_vm1 = vsmask.f32 (!%p186_p3), 7440  ;;  %vm529_vm3 = vcmask (!%p186_p3), 130048   ;;  %vm826_vm4 = vcmask (!%p186_p3), 1042432  }
   0xb   : > { %2392 = vmatpush3.bf16.msra.mxu1 (!%p186_p3), %v2724_v0  ;;  %2464 = vmatpush3.bf16.msra.mxu0 (!%p186_p3), %v2846_v1  ;;  %vm2904_vm2 = vmor (!%p186_p3), %vm301_vm0, %vm302_vm1  ;;  %vm827_vm5 = vcmask (!%p186_p3), 1046532   ;;  %p250_p7 = scmp.lt.s32.totalorder (!%p186_p3), %s2765_s15, 1 }
   0xc   : > { %2409 = vmatprep.subr.bf16.mxu1 (!%p186_p3), %v2857_v2  ;;  %2481 = vmatprep.subr.bf16.mxu0 (!%p186_p3), %v2862_v3  ;;  %vm2987_vm6 = vmor (!%p186_p3), %vm826_vm4, %vm827_vm5 }
  0x10   : > { %s3423_s16 = smov (!%p232_p5, %s2769_s16), 1 }
  0x11   : > { %s2683_s27 = smul.u32 216, %s3423_s16  ;;  %s2161_s29 = sshll.u32 %s3423_s16, 5 }
  0x13   : > { %s236_s8 = scalar_lea.vmem %s3403_s0, %s2683_s27  ;;  %s2159_s27 = sshll.u32 %s2765_s15, 3 }
  0x14   : > { %s2868_s9 = scalar_lea.vmem %s236_s8, %s2309_s26  ;;  %p240_p6 = scmp.lt.s32.totalorder %s2159_s27, 15 }
  0x15   : > { %v2872_v4 = vld [vmem:[%s2868_s9] sm:$0xf]  ;;  %v2875_v5 = vld [vmem:[%s2868_s9 + $0x4] sm:$0xf]  ;;  %v2878_v6 = vld [vmem:[%s2868_s9 + $0x8] sm:$0x1] }
  0x16   : > { %v305_v7 = vshrl.u32 %v2872_v4, 16  ;;  %v308_v8 = vshll.u32 %v2872_v4, 16  ;;  %v314_v9 = vshll.u32 %v2875_v5, 16  ;;  %v318_v10 = vshrl.u32 %v2875_v5, 16  ;;  %v2885_v11 = vld [vmem:[%s2868_s9 + $0xc] sm:$0xf] }
  0x17   : > { %v324_v12 = vshll.u32 %v2878_v6, 16  ;;  %v2889_v13 = vld [vmem:[%s2868_s9 + $0x10] sm:$0xf]  ;;  %v2892_v14 = vld [vmem:[%s2868_s9 + $0x14] sm:$0x1]  ;;  %v329_v20 = vshrl.u32 %v2885_v11, 16 }
  0x18   : > { %v307_v15 = vrot.slane %v305_v7, 4  ;;  %v310_v16 = vrot.slane %v308_v8, 5  ;;  %v316_v17 = vrot.slane %v314_v9, 5  ;;  %v320_v18 = vrot.slane %v318_v10, 4  ;;  %v2900_v27 = vld [vmem:[%s2868_s9 + $0x18] sm:$0xf] }
  0x19   : > { %v326_v19 = vrot.slane %v324_v12, 5  ;;  %v332_v21 = vshll.u32 %v2885_v11, 16  ;;  %v338_v22 = vshll.u32 %v2889_v13, 16  ;;  %v342_v25 = vshrl.u32 %v2889_v13, 16  ;;  %v2909_v32 = vld [vmem:[%s2868_s9 + $0x1c] sm:$0xf] }
  0x1a   : > { %v311_v23 = vor.u32 %v310_v16, %v307_v15  ;;  %v321_v24 = vor.u32 %v320_v18, %v316_v17  ;;  %v348_v26 = vshll.u32 %v2892_v14, 16  ;;  %v331_v29 = vrot.slane %v329_v20, 4  ;;  %v2913_v39 = vld [vmem:[%s2868_s9 + $0x20] sm:$0x1]  ;;  %v2923_v50 = vld [vmem:[%s2868_s9 + $0x24] sm:$0xf] }
  0x1b   : > { %v334_v30 = vrot.slane %v332_v21, 5  ;;  %v340_v31 = vrot.slane %v338_v22, 5  ;;  %v344_v35 = vrot.slane %v342_v25, 4  ;;  %v841_v38 = vrot.slane %v2892_v14, 5  ;;  %v2928_v55 = vld [vmem:[%s2868_s9 + $0x28] sm:$0xf] }
  0x1c   : > { %v312_v33 = vrot.slane %v311_v23, 4  ;;  %v322_v34 = vrot.slane %v321_v24, 4  ;;  %v350_v36 = vrot.slane %v348_v26, 5  ;;  %v353_v40 = vshrl.u32 %v2900_v27, 16  ;;  %v2936_v60 = vld [vmem:[%s2868_s9 + $0x2c] sm:$0x1] }
  0x1d   : > { %v335_v37 = vor.u32 %v334_v30, %v331_v29  ;;  %v356_v41 = vshll.u32 %v2900_v27, 16  ;;  %v345_v44 = vor.u32 %v344_v35, %v340_v31  ;;  %v362_v45 = vshll.u32 %v2909_v32, 16  ;;  %v2942_v7 = vld [vmem:[%s2868_s9 + $0x30] sm:$0xf]  ;;  %v2954_v20 = vld [vmem:[%s2868_s9 + $0x34] sm:$0xf] }
  0x1e   : > { %v317_v42 = vsel %vm2904_vm2, %v312_v33, %v316_v17  ;;  %v327_v43 = vsel %vm2904_vm2, %v322_v34, %v326_v19  ;;  %v355_v48 = vrot.slane %v353_v40, 4  ;;  %v366_v53 = vshrl.u32 %v2909_v32, 16  ;;  %v2949_v15 = vld [vmem:[%s3404_s1 + $0x10] sm:$0xff]   ;;  %v2961_v24 = vld [vmem:[%s2868_s9 + $0x38] sm:$0x1]  ;;  %s3425_s27 = smov (!%p240_p6, %s2159_s27), 15 }
  0x1f   : > { %v2172_v46 = vcombine.low %v317_v42, %v327_v43  ;;  %v336_v47 = vrot.slane %v335_v37, 4  ;;  %v358_v49 = vrot.slane %v356_v41, 5  ;;  %v346_v51 = vrot.slane %v345_v44, 4  ;;  %v2973_v42 = vld [vmem:[%s2868_s9 + $0x3c] sm:$0xf]  ;;  %s2160_s28 = sshll.u32 %s3425_s27, 1 }
  0x20   : > { %v364_v52 = vrot.slane %v362_v45, 5  ;;  %v372_v54 = vshll.u32 %v2913_v39, 16  ;;  %v845_v58 = vrot.slane %v2909_v32, 5  ;;  %v848_v59 = vrot.slane %v2913_v39, 5  ;;  %v2976_v43 = vld [vmem:[%s2868_s9 + $0x40] sm:$0xf]  ;;  %s244_s30 = sadd.s32 %s2161_s29, %s2160_s28 }
  0x21   : > { %2393 = vmatprep.mubr.msk.bf16.mxu1 %vm529_vm3, %v2172_v46  ;;  %v341_v56 = vsel %vm2904_vm2, %v336_v47, %v340_v31  ;;  %v359_v57 = vor.u32 %v358_v49, %v355_v48  ;;  %v351_v61 = vsel %vm2904_vm2, %v346_v51, %v350_v36  ;;  %v368_v62 = vrot.slane %v366_v53, 4  ;;  %v2983_v48 = vld [vmem:[%s3404_s1 + $0x30] sm:$0xff]   ;;  %s2162_s5 = sshll.u32 %s244_s30, 3  ;;  %s3427_s15 = smov (!%p250_p7, %s2765_s15), 1 }
  0x22   : > { %v374_v63 = vrot.slane %v372_v54, 5  ;;  %v377_v0 = vshrl.u32 %v2923_v50, 16  ;;  %v2173_v8 = vcombine.low %v341_v56, %v351_v61  ;;  %v380_v10 = vshll.u32 %v2923_v50, 16  ;;  %s3361_s8 = scalar_lea.vmem %s3405_s2, %s2162_s5 }
  0x23   : > { %v360_v9 = vrot.slane %v359_v57, 4  ;;  %v386_v12 = vshll.u32 %v2928_v55, 16  ;;  %v369_v16 = vor.u32 %v368_v62, %v364_v52  ;;  %v390_v18 = vshrl.u32 %v2928_v55, 16 }
  0x24   : > { %v379_v17 = vrot.slane %v377_v0, 4  ;;  %v396_v19 = vshll.u32 %v2936_v60, 16  ;;  %2465 = vmatprep.mubr.msk.bf16.mxu0 %vm529_vm3, %v2173_v8  ;;  %2394 = vmatmul.mubr.msk.bf16.vlgmr.msra.gmra.mrb[0].mxu1 %vm529_vm3, %v2173_v8  ;;  %v382_v22 = vrot.slane %v380_v10, 5  ;;  %v401_v25 = vshrl.u32 %v2942_v7, 16  ;;  %v3004_v8 = vld [vmem:[%s2868_s9 + $0x44] sm:$0x1] }
  0x25   : > { %v365_v21 = vsel %vm2904_vm2, %v360_v9, %v364_v52  ;;  %v388_v23 = vrot.slane %v386_v12, 5  ;;  %2410 = vmatpush3.bf16.msra.mxu1 %v2857_v2  ;;  %v370_v26 = vrot.slane %v369_v16, 4  ;;  %v392_v29 = vrot.slane %v390_v18, 4 }
  0x26   : > { %v398_v30 = vrot.slane %v396_v19, 5  ;;  %v404_v31 = vshll.u32 %v2942_v7, 16  ;;  %v383_v33 = vor.u32 %v382_v22, %v379_v17  ;;  %v403_v34 = vrot.slane %v401_v25, 4  ;;  %2427 = vmatprep.subr.bf16.mxu1 %v2949_v15 }
  0x27   : > { %v410_v35 = vshll.u32 %v2954_v20, 16  ;;  %v414_v36 = vshrl.u32 %v2954_v20, 16  ;;  %v375_v37 = vsel %vm2904_vm2, %v370_v26, %v374_v63  ;;  %v393_v40 = vor.u32 %v392_v29, %v388_v23 }
  0x28   : > { %v406_v41 = vrot.slane %v404_v31, 5  ;;  %v420_v2 = vshll.u32 %v2961_v24, 16  ;;  %v2978_v44 = vcombine.low %v365_v21, %v375_v37  ;;  %v384_v45 = vrot.slane %v383_v33, 4  ;;  %v3031_v31 = vld [vmem:[%s2868_s9 + $0x4c] sm:$0xf] }
  0x29   : > { %v412_v46 = vrot.slane %v410_v35, 5  ;;  %v416_v47 = vrot.slane %v414_v36, 4  ;;  %v394_v49 = vrot.slane %v393_v40, 4  ;;  %v2207_v54 = vrot.slane %v2885_v11, 9 }
  0x2a   : > { %v407_v51 = vor.u32 %v406_v41, %v403_v34  ;;  %v422_v52 = vrot.slane %v420_v2, 5  ;;  %2466 = vmatmul.mubr.msk.bf16.vlgmr.msra.gmra.mrb[0].mxu0 %vm529_vm3, %v2978_v44  ;;  %2397 = vmatprep.mubr.msk.bf16.mxu1 %vm529_vm3, %v2978_v44  ;;  %v389_v56 = vsel %vm2904_vm2, %v384_v45, %v388_v23  ;;  %v838_v61 = vrot.slane %v2889_v13, 5  ;;  %v3016_v23 = vld [vmem:[%s2868_s9 + $0x48] sm:$0xf]  ;;  %v3048_v45 = vld [vmem:[%s2868_s9 + $0x50] sm:$0x1] }
  0x2b   : > { %v417_v57 = vor.u32 %v416_v47, %v412_v46  ;;  %v425_v62 = vshrl.u32 %v2973_v42, 16  ;;  %2482 = vmatpush3.bf16.msra.mxu0 %v2862_v3  ;;  %v399_v63 = vsel %vm2904_vm2, %v394_v49, %v398_v30  ;;  %v428_v9 = vshll.u32 %v2973_v42, 16 }
  0x2c   : > { %v408_v0 = vrot.slane %v407_v51, 4  ;;  %v434_v10 = vshll.u32 %v2976_v43, 16  ;;  %v3008_v12 = vcombine.low %v389_v56, %v399_v63  ;;  %v839_v17 = vsel %vm2987_vm6, %v2207_v54, %v838_v61  ;;  %2499 = vmatprep.subr.bf16.mxu0 %v2983_v48 }
  0x2d   : > { %v418_v16 = vrot.slane %v417_v57, 4  ;;  %v840_v18 = vrot.slane %v838_v61, 4  ;;  %v427_v19 = vrot.slane %v425_v62, 4  ;;  %v430_v21 = vrot.slane %v428_v9, 5 }
  0x2e   : > { %v413_v3 = vsel %vm2904_vm2, %v408_v0, %v412_v46  ;;  %v436_v22 = vrot.slane %v434_v10, 5  ;;  %2469 = vmatprep.mubr.msk.bf16.mxu0 %vm529_vm3, %v3008_v12  ;;  %2398 = vmatmul.mubr.msk.bf16.gmra.mrb[4].mxu1 %vm529_vm3, %v3008_v12  ;;  %v438_v29 = vshrl.u32 %v2976_v43, 16  ;;  %v444_v30 = vshll.u32 %v3004_v8, 16 }
  0x2f   : > { %v423_v25 = vsel %vm2904_vm2, %v418_v16, %v422_v52  ;;  %v842_v26 = vsel %vm2987_vm6, %v840_v18, %v841_v38  ;;  %v431_v35 = vor.u32 %v430_v21, %v427_v19  ;;  %v2208_v36 = vrot.slane %v2900_v27, 9 }
  0x30   : > { %v3033_v33 = vcombine.low %v413_v3, %v423_v25  ;;  %v3035_v34 = vcombine.low %v839_v17, %v842_v26  ;;  %v440_v37 = vrot.slane %v438_v29, 4  ;;  %v446_v14 = vrot.slane %v444_v30, 5  ;;  %v3073_v17 = vld [vmem:[%s2868_s9 + $0x58] sm:$0xf] }
  0x31   : > { %v847_v40 = vrot.slane %v845_v58, 4  ;;  %v449_v38 = vshrl.u32 %v3016_v23, 16  ;;  %v432_v41 = vrot.slane %v431_v35, 4  ;;  %v846_v2 = vsel %vm2987_vm6, %v2208_v36, %v845_v58  ;;  %v3060_v58 = vld [vmem:[%s2868_s9 + $0x54] sm:$0xf] }
  0x32   : > { %2401 = vmatprep.mubr.msk.bf16.mxu1 %vm529_vm3, %v3033_v33  ;;  %v452_v46 = vshll.u32 %v3016_v23, 16  ;;  %v458_v47 = vshll.u32 %v3031_v31, 16  ;;  %2470 = vmatmul.mubr.msk.bf16.gmra.mrb[4].mxu0 %vm529_vm3, %v3033_v33  ;;  %v441_v49 = vor.u32 %v440_v37, %v436_v22  ;;  %v462_v54 = vshrl.u32 %v3031_v31, 16 }
  0x33   : > { %v849_v51 = vsel %vm2987_vm6, %v847_v40, %v848_v59  ;;  %v451_v52 = vrot.slane %v449_v38, 4  ;;  %2483 = vmatprep.mubr.msk.bf16.mxu0 %vm529_vm3, %v3035_v34  ;;  %v437_v56 = vsel %vm2904_vm2, %v432_v41, %v436_v22  ;;  %v468_v59 = vshll.u32 %v3048_v45, 16  ;;  %v3079_v22 = vld [vmem:[%s2868_s9 + $0x5c] sm:$0x1] }
  0x34   : > { %v3066_v57 = vcombine.low %v846_v2, %v849_v51  ;;  %v454_v61 = vrot.slane %v452_v46, 5  ;;  %v460_v39 = vrot.slane %v458_v47, 5  ;;  %v442_v62 = vrot.slane %v441_v49, 4 }
  0x35   : > { %v464_v63 = vrot.slane %v462_v54, 4  ;;  %v2209_v0 = vrot.slane %v2923_v50, 9  ;;  %v852_v10 = vrot.slane %v2928_v55, 5  ;;  %v855_v16 = vrot.slane %v2936_v60, 5 }
  0x36   : > { %v455_v9 = vor.u32 %v454_v61, %v451_v52  ;;  %v473_v18 = vshrl.u32 %v3060_v58, 16  ;;  %v447_v3 = vsel %vm2904_vm2, %v442_v62, %v446_v14  ;;  %v470_v21 = vrot.slane %v468_v59, 5  ;;  %v3090_v14 = vld [vmem:[%s3404_s1 + $0x38] sm:$0xff]  }
  0x37   : > { %v465_v19 = vor.u32 %v464_v63, %v460_v39  ;;  %v476_v25 = vshll.u32 %v3060_v58, 16  ;;  %v3082_v26 = vcombine.low %v437_v56, %v447_v3  ;;  %v853_v30 = vsel %vm2987_vm6, %v2209_v0, %v852_v10 }
  0x38   : > { %v456_v29 = vrot.slane %v455_v9, 4  ;;  %v854_v60 = vrot.slane %v852_v10, 4  ;;  %v475_v36 = vrot.slane %v473_v18, 4  ;;  %v482_v40 = vshll.u32 %v3073_v17, 16 }
  0x39   : > { %v466_v35 = vrot.slane %v465_v19, 4  ;;  %v478_v37 = vrot.slane %v476_v25, 5  ;;  %2402 = vmatmul.mubr.msk.bf16.gmra.mrb[8].mxu1 %vm529_vm3, %v3082_v26  ;;  %v486_v2 = vshrl.u32 %v3073_v17, 16  ;;  %v492_v46 = vshll.u32 %v3079_v22, 16 }
  0x3a   : > { %v461_v38 = vsel %vm2904_vm2, %v456_v29, %v460_v39  ;;  %v856_v41 = vsel %vm2987_vm6, %v854_v60, %v855_v16  ;;  %2484 = vmatmul.mubr.msk.bf16.vlgmr.msra.gmra.mrb[0].mxu0 %vm529_vm3, %v3066_v57  ;;  %v484_v52 = vrot.slane %v482_v40, 5  ;;  %v2210_v61 = vrot.slane %v2942_v7, 9 }
  0x3b   : > { %v471_v47 = vsel %vm2904_vm2, %v466_v35, %v470_v21  ;;  %v3104_v49 = vcombine.low %v853_v30, %v856_v41  ;;  %v479_v51 = vor.u32 %v478_v37, %v475_v36  ;;  %2500 = vmatpush3.bf16.msra.mxu0 %v2983_v48  ;;  %v488_v56 = vrot.slane %v486_v2, 4  ;;  %v3141_v41 = vld [vmem:[%s2868_s9 + $0x64] sm:$0xf] }
  0x3c   : > { %v3107_v54 = vcombine.low %v461_v38, %v471_v47  ;;  %v859_v62 = vrot.slane %v2954_v20, 5  ;;  %v862_v63 = vrot.slane %v2961_v24, 5  ;;  %v2211_v59 = vrot.slane %v2973_v42, 9  ;;  %2517 = vmatprep.subr.bf16.mxu0 %v3090_v14 }
  0x3d   : > { %2487 = vmatprep.mubr.msk.bf16.mxu0 %vm529_vm3, %v3104_v49  ;;  %v480_v39 = vrot.slane %v479_v51, 4  ;;  %v489_v48 = vor.u32 %v488_v56, %v484_v52  ;;  %v494_v0 = vrot.slane %v492_v46, 5  ;;  %v866_v9 = vrot.slane %v2976_v43, 5  ;;  %v3152_v51 = vld [vmem:[%s2868_s9 + $0x60] sm:$0xf] }
  0x3e   : > { %2405 = vmatprep.mubr.msk.bf16.mxu1 %vm529_vm3, %v3107_v54  ;;  %v869_v10 = vrot.slane %v3004_v8, 5  ;;  %v860_v16 = vsel %vm2987_vm6, %v2210_v61, %v859_v62  ;;  %v861_v18 = vrot.slane %v859_v62, 4  ;;  %v2189_v24 = vcombine.low %v2872_v4, %v2875_v5 }
  0x3f   : > { %v873_v3 = vrot.slane %v3031_v31, 5  ;;  %v485_v19 = vsel %vm2904_vm2, %v480_v39, %v484_v52  ;;  %v490_v21 = vrot.slane %v489_v48, 4  ;;  %v867_v25 = vsel %vm2987_vm6, %v2211_v59, %v866_v9  ;;  %v3163_v39 = vld [vmem:[%s2868_s9 + $0x68] sm:$0x1] }
  0x40   : > { %v868_v29 = vrot.slane %v866_v9, 4  ;;  %v863_v8 = vsel %vm2987_vm6, %v861_v18, %v862_v63  ;;  %v2212_v30 = vrot.slane %v3016_v23, 9  ;;  %v876_v35 = vrot.slane %v3048_v45, 5 }
  0x41   : > { %v875_v60 = vrot.slane %v873_v3, 4  ;;  %v495_v36 = vsel %vm2904_vm2, %v490_v21, %v494_v0  ;;  %v3135_v37 = vcombine.low %v860_v16, %v863_v8  ;;  %v2213_v38 = vrot.slane %v3060_v58, 9 }
  0x42   : > { %v870_v40 = vsel %vm2987_vm6, %v868_v29, %v869_v10  ;;  %v3143_v2 = vcombine.low %v485_v19, %v495_v36  ;;  %v880_v47 = vrot.slane %v3073_v17, 5  ;;  %v883_v45 = vrot.slane %v3079_v22, 5  ;;  %v3188_v19 = vld [vmem:[%s2868_s9 + $0x70] sm:$0xf] }
  0x43   : > { %v3145_v46 = vcombine.low %v867_v25, %v870_v40  ;;  %2488 = vmatmul.mubr.msk.bf16.gmra.mrb[4].mxu0 %vm529_vm3, %v3135_v37  ;;  %v874_v52 = vsel %vm2987_vm6, %v2212_v30, %v873_v3  ;;  %v877_v56 = vsel %vm2987_vm6, %v875_v60, %v876_v35  ;;  %v1340_v22 = vrot.slane %v3141_v41, 5  ;;  %v298_v30 = vld [vmem:[%s2868_s9 + $0x74] sm:$0x1] }
  0x44   : > { %2406 = vmatmul.mubr.msk.bf16.gmra.mrb[12].mxu1 %vm529_vm3, %v3143_v2  ;;  %v882_v61 = vrot.slane %v880_v47, 4  ;;  %v881_v62 = vsel %vm2987_vm6, %v2213_v38, %v880_v47  ;;  %v834_v63 = vrot.slane %v2878_v6, 5  ;;  %v2257_v48 = vrot.slane %v3152_v51, 9 }
  0x45   : > { %2491 = vmatprep.mubr.msk.bf16.mxu0 %vm529_vm3, %v3145_v46  ;;  %2411 = vmatprep.mubr.msk.bf16.mxu1 %vm529_vm3, %v2189_v24  ;;  %v2206_v0 = vrot.slane %v2872_v4, 9  ;;  %v3174_v9 = vcombine.low %v874_v52, %v877_v56  ;;  %v1342_v10 = vrot.slane %v1340_v22, 4  ;;  %v1343_v16 = vrot.slane %v3163_v39, 5  ;;  %v3179_v24 = vld [vmem:[%s2868_s9 + $0x6c] sm:$0xf]  ;;  %s2163_s9 = sshll.u32 %s3423_s16, 1 }
  0x46   : > { %v884_v59 = vsel %vm2987_vm6, %v882_v61, %v883_v45  ;;  %v831_v18 = vrot.slane %v2875_v5, 5  ;;  %v3183_v6 = vcombine.low %v2885_v11, %v2889_v13  ;;  %v1604_v4 = vshrl.u32 %v3179_v24, 16  ;;  %v2739_v13 = vld [vmem:[%s3404_s1 + $0x18] sm:$0xff]   ;;  %s253_s10 = sadd.s32 %s2163_s9, %s3427_s15 }
  0x47   : > { %v3185_v3 = vcombine.low %v881_v62, %v884_v59  ;;  %v1607_v21 = vshll.u32 %v3179_v24, 16  ;;  %v3194_v25 = vcombine.low %v2900_v27, %v2909_v32  ;;  %v1617_v8 = vshrl.u32 %v3188_v19, 16  ;;  %s2164_s11 = sshll.u32 %s253_s10, 3 }
  0x48   : > { %v832_v5 = vsel %vm2987_vm6, %v2206_v0, %v831_v18  ;;  %v833_v29 = vrot.slane %v831_v18, 4  ;;  %v1341_v11 = vsel %vm2987_vm6, %v2257_v48, %v1340_v22  ;;  %v1344_v27 = vsel %vm2987_vm6, %v1342_v10, %v1343_v16  ;;  %s255_s14 = scalar_lea.vmem %s3406_s3, %s2164_s11  ;;  %s263_s23 = scalar_lea.vmem %s3407_s4, %s2164_s11 }
  0x49   : > { %v1606_v60 = vrot.slane %v1604_v4, 4  ;;  %v1609_v35 = vrot.slane %v1607_v21, 5  ;;  %v1613_v38 = vshll.u32 %v3188_v19, 16  ;;  %v1619_v47 = vrot.slane %v1617_v8, 4 }
  0x4a   : > { %v835_v32 = vsel %vm2987_vm6, %v833_v29, %v834_v63  ;;  %v3219_v45 = vcombine.low %v1341_v11, %v1344_v27  ;;  %v1623_v52 = vshll.u32 %v298_v30, 16  ;;  %v2294_v56 = vrot.slane %v3179_v24, 9 }
  0x4b   : > { %2492 = vmatmul.mubr.msk.bf16.gmra.mrb[8].mxu0 %vm529_vm3, %v3174_v9  ;;  %v2216_v36 = vcombine.low %v832_v5, %v835_v32  ;;  %v1610_v40 = vor.u32 %v1609_v35, %v1606_v60  ;;  %v1615_v22 = vrot.slane %v1613_v38, 5  ;;  %v1758_v62 = vrot.slane %v3188_v19, 5  ;;  %v2742_v5 = vld [vmem:[%s3404_s1 + $0x40] sm:$0xff]  }
  0x4c   : > { %2412 = vmatmul.mubr.msk.bf16.vlgmr.msra.gmra.mrb[0].mxu1 %vm529_vm3, %v3183_v6  ;;  %2495 = vmatprep.mubr.msk.bf16.mxu0 %vm529_vm3, %v3185_v3  ;;  %v1761_v63 = vrot.slane %v298_v30, 5  ;;  %v3229_v59 = vcombine.low %v2942_v7, %v2954_v20  ;;  %v1625_v48 = vrot.slane %v1623_v52, 5  ;;  %v2194_v53 = vcombine.low %v2973_v42, %v2976_v43 }
  0x4d   : > { %2428 = vmatpush3.bf16.msra.mxu1 %v2949_v15  ;;  %2415 = vmatprep.mubr.msk.bf16.mxu1 %vm529_vm3, %v3194_v25  ;;  %v1611_v61 = vrot.slane %v1610_v40, 4  ;;  %v3225_v15 = vcombine.low %v2923_v50, %v2928_v55  ;;  %v1620_v10 = vor.u32 %v1619_v47, %v1615_v22  ;;  %v3235_v16 = vsel %vm2987_vm6, %v2294_v56, %v1758_v62 }
  0x4e   : > { %2445 = vmatprep.subr.bf16.mxu1 %v2739_v13  ;;  %v1760_v18 = vrot.slane %v1758_v62, 4  ;;  %v2195_v21 = vcombine.low %v3016_v23, %v3031_v31  ;;  %v2196_v42 = vcombine.low %v3060_v58, %v3073_v17  ;;  %v2235_v43 = vcombine.low %v3152_v51, %v3141_v41 }
  0x4f   : > { %v1616_v0 = vsel %vm2904_vm2, %v1611_v61, %v1615_v22  ;;  %v1621_v4 = vrot.slane %v1620_v10, 4  ;;  %v2272_v23 = vcombine.low %v3179_v24, %v3188_v19  ;;  %v1186_v31 = vshrl.u32 %v3152_v51, 16 }
  0x50   : > { %v3241_v50 = vsel %vm2987_vm6, %v1760_v18, %v1761_v63  ;;  %v1195_v58 = vshll.u32 %v3141_v41, 16  ;;  %v1199_v17 = vshrl.u32 %v3141_v41, 16  ;;  %v1205_v41 = vshll.u32 %v3163_v39, 16 }
  0x51   : > { %v2297_v55 = vcombine.low %v3235_v16, %v3241_v50  ;;  %v1626_v7 = vsel %vm2904_vm2, %v1621_v4, %v1625_v48 }
  0x52   : > { %v2284_v20 = vcombine.low %v1616_v0, %v1626_v7  ;;  %v1197_v19 = vrot.slane %v1195_v58, 5  ;;  %v1201_v29 = vrot.slane %v1199_v17, 4 }
  0x53   : > { %2496 = vmatmul.mubr.msk.bf16.gmra.mrb[12].mxu0 %vm529_vm3, %v3219_v45 }
  0x54   : > { %2416 = vmatmul.mubr.msk.bf16.gmra.mrb[4].mxu1 %vm529_vm3, %v3225_v15  ;;  %2501 = vmatprep.mubr.msk.bf16.mxu0 %vm529_vm3, %v3194_v25 }
  0x55   : > { %2419 = vmatprep.mubr.msk.bf16.mxu1 %vm529_vm3, %v3229_v59 }
  0x5b   : > { %2502 = vmatmul.mubr.msk.bf16.vlgmr.msra.gmra.mrb[0].mxu0 %vm529_vm3, %v3225_v15 }
  0x5c   : > { %2420 = vmatmul.mubr.msk.bf16.gmra.mrb[8].mxu1 %vm529_vm3, %v2194_v53  ;;  %2518 = vmatpush3.bf16.msra.mxu0 %v3090_v14  ;;  %v1188_v14 = vrot.slane %v1186_v31, 4 }
  0x5d   : > { %2423 = vmatprep.mubr.msk.bf16.mxu1 %vm529_vm3, %v2195_v21  ;;  %2505 = vmatprep.mubr.msk.bf16.mxu0 %vm529_vm3, %v3229_v59 }
  0x5e   : > { %2535 = vmatprep.subr.bf16.mxu0 %v2742_v5 }
  0x63   : > { %2506 = vmatmul.mubr.msk.bf16.gmra.mrb[4].mxu0 %vm529_vm3, %v2194_v53 }
  0x64   : > { %2424 = vmatmul.mubr.msk.bf16.gmra.mrb[12].mxu1 %vm529_vm3, %v2196_v42  ;;  %2509 = vmatprep.mubr.msk.bf16.mxu0 %vm529_vm3, %v2195_v21 }
  0x65   : > { %2429 = vmatprep.mubr.msk.bf16.mxu1 %vm529_vm3, %v2216_v36 }
  0x6b   : > { %2510 = vmatmul.mubr.msk.bf16.gmra.mrb[8].mxu0 %vm529_vm3, %v2196_v42 }
  0x6c   : > { %2430 = vmatmul.mubr.msk.bf16.vlgmr.msra.gmra.mrb[0].mxu1 %vm529_vm3, %v3035_v34  ;;  %2513 = vmatprep.mubr.msk.bf16.mxu0 %vm529_vm3, %v2235_v43  ;;  %v1189_v34 = vshll.u32 %v3152_v51, 16  ;;  %v1202_v51 = vor.u32 %v1201_v29, %v1197_v19 }
  0x6d   : > { %2446 = vmatpush3.bf16.msra.mxu1 %v2739_v13  ;;  %2433 = vmatprep.mubr.msk.bf16.mxu1 %vm529_vm3, %v3066_v57  ;;  %v1207_v13 = vrot.slane %v1205_v41, 5 }
  0x6e   : > { %2553 = vmatprep.subr.bf16.mxu1 %v2846_v1  ;;  %v1191_v24 = vrot.slane %v1189_v34, 5  ;;  %v1203_v11 = vrot.slane %v1202_v51, 4 }
  0x73   : > { %2514 = vmatmul.mubr.msk.bf16.gmra.mrb[12].mxu0 %vm529_vm3, %v2272_v23 }
  0x74   : > { %2434 = vmatmul.mubr.msk.bf16.gmra.mrb[4].mxu1 %vm529_vm3, %v3104_v49  ;;  %2519 = vmatprep.mubr.msk.bf16.mxu0 %vm529_vm3, %v2978_v44  ;;  %v1192_v44 = vor.u32 %v1191_v24, %v1188_v14 }
  0x75   : > { %2437 = vmatprep.mubr.msk.bf16.mxu1 %vm529_vm3, %v3135_v37 }
  0x76   : > { %v1193_v8 = vrot.slane %v1192_v44, 4 }
  0x7b   : > { %2520 = vmatmul.mubr.msk.bf16.vlgmr.msra.gmra.mrb[0].mxu0 %vm529_vm3, %v3008_v12  ;;  %v1198_v12 = vsel %vm2904_vm2, %v1193_v8, %v1197_v19 }
  0x7c   : > { %2438 = vmatmul.mubr.msk.bf16.gmra.mrb[8].mxu1 %vm529_vm3, %v3145_v46  ;;  %2536 = vmatpush3.bf16.msra.mxu0 %v2742_v5 }
  0x7d   : > { %2441 = vmatprep.mubr.msk.bf16.mxu1 %vm529_vm3, %v3174_v9  ;;  %2523 = vmatprep.mubr.msk.bf16.mxu0 %vm529_vm3, %v3033_v33  ;;  %v1208_v33 = vsel %vm2904_vm2, %v1203_v11, %v1207_v13 }
  0x7e   : > { %v2247_v39 = vcombine.low %v1198_v12, %v1208_v33 }
  0x83   : > { %2524 = vmatmul.mubr.msk.bf16.gmra.mrb[4].mxu0 %vm529_vm3, %v3082_v26 }
  0x84   : > { %2442 = vmatmul.mubr.msk.bf16.gmra.mrb[12].mxu1 %vm529_vm3, %v3185_v3  ;;  %2527 = vmatprep.mubr.msk.bf16.mxu0 %vm529_vm3, %v3107_v54 }
  0x85   : > { %2447 = vmatprep.mubr.msk.bf16.mxu1 %vm529_vm3, %v3183_v6 }
  0x8b   : > { %2528 = vmatmul.mubr.msk.bf16.gmra.mrb[8].mxu0 %vm529_vm3, %v3143_v2 }
  0x8c   : > { %2448 = vmatmul.mubr.msk.bf16.vlgmr.msra.gmra.mrb[0].mxu1 %vm529_vm3, %v3194_v25  ;;  %2531 = vmatprep.mubr.msk.bf16.mxu0 %vm529_vm3, %v2247_v39 }
  0x8d   : > { %2554 = vmatpush3.bf16.msra.mxu1 %v2846_v1  ;;  %2451 = vmatprep.mubr.msk.bf16.mxu1 %vm529_vm3, %v3225_v15 }
  0x93   : > { %2532 = vmatmul.mubr.msk.bf16.gmra.mrb[12].mxu0 %vm529_vm3, %v2284_v20 }
  0x94   : > { %2452 = vmatmul.mubr.msk.bf16.gmra.mrb[4].mxu1 %vm529_vm3, %v3229_v59  ;;  %2537 = vmatprep.mubr.msk.bf16.mxu0 %vm529_vm3, %v3066_v57 }
  0x95   : > { %2455 = vmatprep.mubr.msk.bf16.mxu1 %vm529_vm3, %v2194_v53 }
  0x9b   : > { %2538 = vmatmul.mubr.msk.bf16.vlgmr.msra.gmra.mrb[0].mxu0 %vm529_vm3, %v3104_v49 }
  0x9c   : > { %2456 = vmatmul.mubr.msk.bf16.gmra.mrb[8].mxu1 %vm529_vm3, %v2195_v21  ;;  %2541 = vmatprep.mubr.msk.bf16.mxu0 %vm529_vm3, %v3135_v37 }
  0x9d   : > { %2459 = vmatprep.mubr.msk.bf16.mxu1 %vm529_vm3, %v2196_v42 }
  0xa3   : > { %2542 = vmatmul.mubr.msk.bf16.gmra.mrb[4].mxu0 %vm529_vm3, %v3145_v46 }
  0xa4   : > { %2460 = vmatmul.mubr.msk.bf16.gmra.mrb[12].mxu1 %vm529_vm3, %v2235_v43  ;;  %2545 = vmatprep.mubr.msk.bf16.mxu0 %vm529_vm3, %v3174_v9 }
  0xa5   : > { %2473 = vmatprep.mubr.msk.bf16.mxu1 %vm529_vm3, %v3082_v26 }
  0xab   : > { %2546 = vmatmul.mubr.msk.bf16.gmra.mrb[8].mxu0 %vm529_vm3, %v3185_v3 }
  0xac   : > { %2474 = vmatmul.mubr.msk.bf16.vlgmr.msra.gmra.mrb[8].mxu1 %vm529_vm3, %v3107_v54  ;;  %2549 = vmatprep.mubr.msk.bf16.mxu0 %vm529_vm3, %v3219_v45 }
  0xad   : > { %2477 = vmatprep.mubr.msk.bf16.mxu1 %vm529_vm3, %v3143_v2 }
  0xb3   : > { %2550 = vmatmul.mubr.msk.bf16.gmra.mrb[12].mxu0 %vm529_vm3, %v2297_v55 }
  0xb4   : > { %2478 = vmatmul.mubr.msk.bf16.gmra.mrb[12].mxu1 %vm529_vm3, %v2247_v39 }
 0x15f   : > { %v2449_v1 = vpop.f32.mrb[0].mxu1 }
 0x160   : > { %v1106_v28 = vpop.f32.mrb[1].mxu1 }
 0x161   : > { %v2450_v57 = vpop.f32.mrb[2].mxu1 }
 0x162   : > { %v1109_v26 = vpop.f32.mrb[3].mxu1 }
 0x167   : > { %v2453_v49 = vpop.f32.mrb[4].mxu1 }
 0x168   : > { %v1122_v54 = vpop.f32.mrb[5].mxu1 }
 0x169   : > { %v2454_v37 = vpop.f32.mrb[6].mxu1 }
 0x16a   : > { %v1125_v2 = vpop.f32.mrb[7].mxu1 }
 0x16e   : > { %v2539_v46 = vpop.f32.mrb[0].mxu0 }
 0x16f   : > { %v2555_v9 = vadd.f32 %v2539_v46, %v2449_v1  ;;  %v1812_v6 = vpop.f32.mrb[1].mxu0 }
 0x170   : > { %v2556_v3 = vadd.f32 %v1812_v6, %v1106_v28  ;;  %v2540_v25 = vpop.f32.mrb[2].mxu0 }
 0x171   : > { %1893 = vst [vmem:[%s3361_s8 + $0x10] sm:$0xff] %v2555_v9  ;;  %v2557_v27 = vadd.f32 %v2540_v25, %v2450_v57  ;;  %v1815_v32 = vpop.f32.mrb[3].mxu0  ;;  %v1931_v40 = vmul.f32 %v2555_v9, %v2555_v9 }
 0x172   : > { %1891 = vst [vmem:[%s3361_s8] sm:$0xff] %v2556_v3  ;;  %v2558_v30 = vadd.f32 %v1815_v32, %v1109_v26  ;;  %v1929_v60 = vmul.f32 %v2556_v3, %v2556_v3 }
 0x173   : > { %1894 = vst [vmem:[%s3361_s8 + $0x18] sm:$0xff] %v2557_v27  ;;  %v1932_v61 = vmul.f32 %v2557_v27, %v2557_v27 }
 0x174   : > { %1892 = vst [vmem:[%s3361_s8 + $0x8] sm:$0xff] %v2558_v30  ;;  %v1907_v35 = vadd.f32 %v2558_v30, %v2556_v3  ;;  %v1930_v36 = vmul.f32 %v2558_v30, %v2558_v30 }
 0x176   : > { %v1908_v38 = vadd.f32 %v2555_v9, %v1907_v35  ;;  %v1945_v47 = vadd.f32 %v1930_v36, %v1929_v60  ;;  %v2543_v45 = vpop.f32.mrb[4].mxu0 }
 0x177   : > { %v2559_v52 = vadd.f32 %v2543_v45, %v2453_v49  ;;  %v1828_v56 = vpop.f32.mrb[5].mxu0 }
 0x178   : > { %v1946_v22 = vadd.f32 %v1945_v47, %v1931_v40  ;;  %v2560_v62 = vadd.f32 %v1828_v56, %v1122_v54  ;;  %v1909_v63 = vadd.f32 %v2557_v27, %v1908_v38  ;;  %v2544_v15 = vpop.f32.mrb[6].mxu0 }
 0x179   : > { %1897 = vst [vmem:[%s3361_s8 + $0x30] sm:$0xff] %v2559_v52  ;;  %v2561_v59 = vadd.f32 %v2544_v15, %v2454_v37  ;;  %v1831_v48 = vpop.f32.mrb[7].mxu0  ;;  %v1935_v7 = vmul.f32 %v2559_v52, %v2559_v52 }
 0x17a   : > { %1895 = vst [vmem:[%s3361_s8 + $0x20] sm:$0xff] %v2560_v62  ;;  %v1910_v0 = vadd.f32 %v2560_v62, %v1909_v63  ;;  %v1933_v10 = vmul.f32 %v2560_v62, %v2560_v62  ;;  %v1947_v16 = vadd.f32 %v1946_v22, %v1932_v61  ;;  %v2562_v18 = vadd.f32 %v1831_v48, %v1125_v2 }
 0x17b   : > { %1898 = vst [vmem:[%s3361_s8 + $0x38] sm:$0xff] %v2561_v59  ;;  %v1936_v43 = vmul.f32 %v2561_v59, %v2561_v59 }
 0x17c   : > { %v1948_v4 = vadd.f32 %v1947_v16, %v1933_v10  ;;  %1896 = vst [vmem:[%s3361_s8 + $0x28] sm:$0xff] %v2562_v18  ;;  %v1911_v50 = vadd.f32 %v2562_v18, %v1910_v0  ;;  %v1934_v55 = vmul.f32 %v2562_v18, %v2562_v18 }
 0x17e   : > { %v1912_v20 = vadd.f32 %v2559_v52, %v1911_v50  ;;  %v1949_v53 = vadd.f32 %v1948_v4, %v1934_v55  ;;  %v2547_v21 = vpop.f32.mrb[8].mxu0 }
 0x17f   : > { %v2475_v5 = vpop.f32.mrb[8].mxu1  ;;  %v1844_v42 = vpop.f32.mrb[9].mxu0 }
 0x180   : > { %v1950_v23 = vadd.f32 %v1949_v53, %v1935_v7  ;;  %v2563_v31 = vadd.f32 %v2547_v21, %v2475_v5  ;;  %v1290_v34 = vpop.f32.mrb[9].mxu1  ;;  %v1913_v58 = vadd.f32 %v2561_v59, %v1912_v20  ;;  %v2548_v17 = vpop.f32.mrb[10].mxu0 }
 0x181   : > { %v2564_v14 = vadd.f32 %v1844_v42, %v1290_v34  ;;  %v2476_v24 = vpop.f32.mrb[10].mxu1  ;;  %v1847_v19 = vpop.f32.mrb[11].mxu0 }
 0x182   : > { %1901 = vst [vmem:[%s3361_s8 + $0x50] sm:$0xff] %v2563_v31  ;;  %v1951_v29 = vadd.f32 %v1950_v23, %v1936_v43  ;;  %v2565_v44 = vadd.f32 %v2548_v17, %v2476_v24  ;;  %v1293_v51 = vpop.f32.mrb[11].mxu1  ;;  %v1939_v1 = vmul.f32 %v2563_v31, %v2563_v31 }
 0x183   : > { %1899 = vst [vmem:[%s3361_s8 + $0x40] sm:$0xff] %v2564_v14  ;;  %v1914_v41 = vadd.f32 %v2564_v14, %v1913_v58  ;;  %v1937_v8 = vmul.f32 %v2564_v14, %v2564_v14  ;;  %v2566_v11 = vadd.f32 %v1847_v19, %v1293_v51 }
 0x184   : > { %1902 = vst [vmem:[%s3361_s8 + $0x58] sm:$0xff] %v2565_v44  ;;  %v1940_v46 = vmul.f32 %v2565_v44, %v2565_v44 }
 0x185   : > { %v1952_v13 = vadd.f32 %v1951_v29, %v1937_v8  ;;  %1900 = vst [vmem:[%s3361_s8 + $0x48] sm:$0xff] %v2566_v11  ;;  %v1915_v12 = vadd.f32 %v2566_v11, %v1914_v41  ;;  %v1938_v33 = vmul.f32 %v2566_v11, %v2566_v11 }
 0x186   : > { %v2551_v39 = vpop.f32.mrb[12].mxu0 }
 0x187   : > { %v1916_v28 = vadd.f32 %v2563_v31, %v1915_v12  ;;  %v1953_v57 = vadd.f32 %v1952_v13, %v1938_v33  ;;  %v2479_v26 = vpop.f32.mrb[12].mxu1  ;;  %v1860_v49 = vpop.f32.mrb[13].mxu0 }
 0x188   : > { %v2567_v54 = vadd.f32 %v2551_v39, %v2479_v26  ;;  %v1306_v37 = vpop.f32.mrb[13].mxu1  ;;  %v2552_v2 = vpop.f32.mrb[14].mxu0 }
 0x189   : > { %v1954_v9 = vadd.f32 %v1953_v57, %v1939_v1  ;;  %v2568_v6 = vadd.f32 %v1860_v49, %v1306_v37  ;;  %v1917_v3 = vadd.f32 %v2565_v44, %v1916_v28  ;;  %v2480_v25 = vpop.f32.mrb[14].mxu1  ;;  %v1863_v27 = vpop.f32.mrb[15].mxu0 }
 0x18a   : > { %1905 = vst [vmem:[%s3361_s8 + $0x70] sm:$0xff] %v2567_v54  ;;  %v2569_v32 = vadd.f32 %v2552_v2, %v2480_v25  ;;  %v1309_v30 = vpop.f32.mrb[15].mxu1  ;;  %v1943_v52 = vmul.f32 %v2567_v54, %v2567_v54 }
 0x18b   : > { %1903 = vst [vmem:[%s3361_s8 + $0x60] sm:$0xff] %v2568_v6  ;;  %v1918_v60 = vadd.f32 %v2568_v6, %v1917_v3  ;;  %v1941_v35 = vmul.f32 %v2568_v6, %v2568_v6  ;;  %v1955_v36 = vadd.f32 %v1954_v9, %v1940_v46  ;;  %v2570_v40 = vadd.f32 %v1863_v27, %v1309_v30 }
 0x18c   : > { %1906 = vst [vmem:[%s3361_s8 + $0x78] sm:$0xff] %v2569_v32  ;;  %v1944_v22 = vmul.f32 %v2569_v32, %v2569_v32 }
 0x18d   : > { %v1956_v38 = vadd.f32 %v1955_v36, %v1941_v35  ;;  %1904 = vst [vmem:[%s3361_s8 + $0x68] sm:$0xff] %v2570_v40  ;;  %v1919_v47 = vadd.f32 %v2570_v40, %v1918_v60  ;;  %v1942_v45 = vmul.f32 %v2570_v40, %v2570_v40 }
 0x18f   : > { %v1920_v56 = vadd.f32 %v2567_v54, %v1919_v47  ;;  %v1957_v61 = vadd.f32 %v1956_v38, %v1942_v45 }
 0x191   : > { %v1921_v62 = vadd.f32 %v2569_v32, %v1920_v56  ;;  %v1958_v63 = vadd.f32 %v1957_v61, %v1943_v52 }
 0x193   : > { %v1922_v15 = vrot.slane %v1921_v62, 4  ;;  %v1959_v59 = vadd.f32 %v1958_v63, %v1944_v22 }
 0x195   : > { %v1923_v48 = vadd.f32 %v1922_v15, %v1921_v62  ;;  %v1960_v0 = vrot.slane %v1959_v59, 4 }
 0x197   : > { %v1924_v10 = vrot.slane %v1923_v48, 2  ;;  %v1961_v16 = vadd.f32 %v1960_v0, %v1959_v59 }
 0x199   : > { %v1925_v18 = vadd.f32 %v1924_v10, %v1923_v48  ;;  %v1962_v4 = vrot.slane %v1961_v16, 2 }
 0x19b   : > { %v1926_v50 = vrot.slane %v1925_v18, 1  ;;  %v1963_v55 = vadd.f32 %v1962_v4, %v1961_v16 }
 0x19d   : > { %v1927_v7 = vadd.f32 %v1926_v50, %v1925_v18  ;;  %v1964_v20 = vrot.slane %v1963_v55, 1 }
 0x19f   : > { %1928 = vst [vmem:[%s255_s14] sm:$0xff] %v1927_v7  ;;  %v1965_v53 = vadd.f32 %v1964_v20, %v1963_v55 }
 0x1a1   : > { %1966 = vst [vmem:[%s263_s23] sm:$0xff] %v1965_v53 }
 0x1a2 PF: > { %s15_s19 = sadd.s32 1, %s2781_s19   ;;  %s3412_s15 = smov %s2773_s17 }
 0x1a3   : > { %p12_p8 = scmp.ge.s32.totalorder %s15_s19, 6   ;;  %s3413_s16 = smov %s2777_s18 }
 0x1a4   : > { %s3414_s17 = smov %s3417_s20  ;;  %s3415_s18 = smov %s3421_s21 }
 0x1a5   :  { %14 = sbr.rel (!%p12_p8) target bundleno = 3 (0x3), region = 91 }

</bundles_post_ra>
